<compile_context>
chip_gen: v6e
topology: v6e:2x2x1
jax: 0.10.0
libtpu: 0.0.40
codegen_flags: <defaults>
</compile_context>

<pallas_src>
import functools

import jax
import jax.numpy as jnp
from jax.experimental import pallas as pl
from jax.experimental.pallas import tpu as pltpu


# --------------------------------------------------------------------------
# Pallas kernel
# --------------------------------------------------------------------------
def _skilled_lora_kernel(w_ref, x_ref, wt_ref, bias_ref, a_ref, b_ref,
                         mixer_ref, o_ref, *scratch, tk, out_is_f32):
    # w_ref    : VMEM (tm, nsr)      f32  per-row skill weights (repeated r)
    # x_ref    : VMEM (tm, tk)       bf16 flattened activations tile
    # wt_ref   : VMEM (tk, tn)       bf16 base weight tile (pre-transposed)
    # bias_ref : VMEM (1, tn)        f32
    # a_ref    : VMEM (D_in_p, nsr)  bf16 stacked LoRA A (fully resident)
    # b_ref    : VMEM (nsr, tn)      bf16 stacked LoRA B (scaling folded in)
    # mixer_ref: VMEM (nsr, nsr)     f32  constant skill-mix matrix
    # o_ref    : VMEM (tm, tn)
    # scratch  : [acc (tm,tn) f32 if output isn't f32], z_acc (tm,nsr) f32,
    #            zb (tm,nsr) bf16
    if out_is_f32:
        z_acc, zb_ref = scratch
        acc = o_ref                      # accumulate straight into the output
    else:
        acc, z_acc, zb_ref = scratch

    j = pl.program_id(1)
    k = pl.program_id(2)
    nk = pl.num_programs(2)

    x = x_ref[...]                                           # (tm, tk) bf16

    @pl.when(k == 0)
    def _init():
        # Fold the bias into the accumulator init (saves one (tm, tn) add).
        acc[...] = jnp.broadcast_to(bias_ref[...], acc.shape)

    acc[...] += jnp.dot(x, wt_ref[...], preferred_element_type=jnp.float32)

    # LoRA-A path: z = x @ A_all depends only on (i, k).  Compute it once per
    # row tile (at j == 0) and reuse the scratch-carried result for j > 0.
    @pl.when(j == 0)
    def _lora_a():
        @pl.when(k == 0)
        def _():
            z_acc[...] = jnp.zeros_like(z_acc)

        kk = pl.multiple_of(k * tk, tk)
        z_acc[...] += jnp.dot(x, a_ref[pl.ds(kk, tk), :],
                              preferred_element_type=jnp.float32)

        @pl.when(k == nk - 1)
        def _mix():
            nsr_w = w_ref[...]                               # (tm, nsr) f32
            # zw[:, s*r+j] = w_s * (x @ A_s)[:, j]
            zw = z_acc[...] * nsr_w
            # mixer[a, b] = 1 iff a % r == b % r, so
            #   (zw @ mixer)[:, s*r+j] = (x @ A_mix)[:, j] (replicated / skill)
            z_b = jnp.dot(zw, mixer_ref[...],
                          preferred_element_type=jnp.float32) * nsr_w
            # z_b[:, s*r+j] = w_s * (x @ A_mix)[:, j]; cache in bf16 so the
            # per-j LoRA-B matmul stays on the bf16 MXU path.
            zb_ref[...] = z_b.astype(zb_ref.dtype)

    @pl.when(k == nk - 1)
    def _flush():
        # zb @ B_all = (x @ A_mix) @ (sum_s w_s B_s) = (x @ A_mix) @ B_mix.
        lora = jnp.dot(zb_ref[...], b_ref[...],
                       preferred_element_type=jnp.float32)
        if out_is_f32:
            o_ref[...] += lora
        else:
            o_ref[...] = (acc[...] + lora).astype(o_ref.dtype)


# --------------------------------------------------------------------------
# Wrapper: layout transforms + pallas_call
# --------------------------------------------------------------------------
def _round_up(x, m):
    return ((x + m - 1) // m) * m


def _choose_tile(dim, cap, align):
    """Tile <= cap (multiple of align) plus the padded dim it divides."""
    cap = max(align, (cap // align) * align)
    if dim <= cap:
        t = _round_up(dim, align)
        return t, t
    # Prefer an exact divisor in [cap/2, cap] to avoid padding waste.
    t = cap
    while t >= max(align, cap // 2):
        if dim % t == 0:
            return t, dim
        t -= align
    return cap, _round_up(dim, cap)


def _vmem_capacity_bytes():
    try:
        return int(pltpu.get_tpu_info().vmem_capacity_bytes)
    except Exception:
        return 64 << 20   # conservative: v7x per-TensorCore VMEM


def _pad2(arr, r, c):
    pr, pc = r - arr.shape[0], c - arr.shape[1]
    if pr or pc:
        arr = jnp.pad(arr, ((0, pr), (0, pc)))
    return arr


def skilled_lora_forward(skill_weights, x, weight_t, bias, lora_a, lora_b,
                         *, scaling, tm=None, tn=None, tk=None):
    """skill_weights: (B, n_skills) f32; x: (B, S, D_in); weight_t: (D_in, D_out)."""
    B, S, D_in = x.shape
    D_out = weight_t.shape[1]
    n_skills, _, rank = lora_a.shape
    nsr = n_skills * rank
    rows = B * S
    out_dtype = jnp.dtype(x.dtype)
    out_is_f32 = out_dtype == jnp.dtype(jnp.float32)

    # ---- generation-aware tile caps / VMEM clamp ---------------------------
    vmem_cap = _vmem_capacity_bytes()
    big_vmem = vmem_cap >= (100 << 20)        # v5e / v6e (128 MiB VMEM)
    tm_cap = 1024
    tn_cap = 2048 if big_vmem else 1024       # v6e needs ~650 FLOP/byte
    tk_cap = 512

    if tm is None:
        tm, rows_p = _choose_tile(rows, tm_cap, 8)
    else:
        rows_p = _round_up(rows, tm)
    if tn is None:
        tn, dout_p = _choose_tile(D_out, tn_cap, 128)
    else:
        dout_p = _round_up(D_out, tn)
    if tk is None:
        tk, din_p = _choose_tile(D_in, tk_cap, 128)
    else:
        din_p = _round_up(D_in, tk)

    # Megacore (v7x): prefer >= 2 row tiles when the row extent is big enough
    # so the two TensorCores get balanced halves of the "parallel" axis.
    if rows_p // tm == 1 and rows_p >= 512:
        tm = max(8, _round_up(rows_p // 2, 8))
        rows_p = _round_up(rows, tm)

    # ---- operand layout ----------------------------------------------------
    # Lane-dense stacked LoRA operands; fold `scaling` into B_all.
    a_all = jnp.transpose(lora_a, (1, 0, 2)).reshape(D_in, nsr)
    b_all = (scaling * lora_b).reshape(nsr, D_out)

    # Per-row, per-skill mixing weights (each skill weight repeated `rank`
    # times so in-kernel multiplies stay 2-D and lane-aligned with z).
    w_rows = jnp.repeat(jnp.repeat(skill_weights.astype(jnp.float32),
                                   rank, axis=1), S, axis=0)      # (rows, nsr)

    # Constant skill "mixer": mixer[a, b] = 1 iff a % r == b % r (host-built).
    idx = jnp.arange(nsr) % rank
    mixer = (idx[:, None] == idx[None, :]).astype(jnp.float32)

    # bf16 matmul operands; accumulation stays f32 inside the kernel.
    x_p = _pad2(x.reshape(rows, D_in).astype(jnp.bfloat16), rows_p, din_p)
    w_rows_p = _pad2(w_rows, rows_p, nsr)
    wt_p = _pad2(weight_t.astype(jnp.bfloat16), din_p, dout_p)
    bias_p = _pad2(bias.astype(jnp.float32).reshape(1, D_out), 1, dout_p)
    a_p = _pad2(a_all.astype(jnp.bfloat16), din_p, nsr)
    b_p = _pad2(b_all.astype(jnp.bfloat16), nsr, dout_p)

    grid = (rows_p // tm, dout_p // tn, din_p // tk)

    # ---- VMEM budget (double-buffered pipelined blocks + resident + scratch)
    out_itemsize = out_dtype.itemsize
    pipelined = (tm * nsr * 4            # skill weights
                 + tm * tk * 2           # x
                 + tk * tn * 2           # W^T
                 + 8 * tn * 4            # bias (sublane-padded)
                 + max(nsr, 8) * tn * 2  # B_all tile
                 + tm * tn * out_itemsize)
    resident = (din_p * max(nsr, 128) * 2          # A_all (lane-padded)
                + max(nsr, 8) * max(nsr, 128) * 4)  # mixer
    scratch_bytes = tm * max(nsr, 128) * (4 + 2)
    if not out_is_f32:
        scratch_bytes += tm * tn * 4
    vmem_limit = 2 * pipelined + resident + scratch_bytes + (2 << 20)
    vmem_limit = int(min(max(vmem_limit, 16 << 20), int(vmem_cap * 0.9)))

    kernel = functools.partial(_skilled_lora_kernel,
                               tk=tk, out_is_f32=out_is_f32)

    scratch_shapes = []
    if not out_is_f32:
        scratch_shapes.append(pltpu.VMEM((tm, tn), jnp.float32))
    scratch_shapes += [pltpu.VMEM((tm, nsr), jnp.float32),
                       pltpu.VMEM((tm, nsr), jnp.bfloat16)]

    out_flat = pl.pallas_call(
        kernel,
        out_shape=jax.ShapeDtypeStruct((rows_p, dout_p), out_dtype),
        grid_spec=pltpu.PrefetchScalarGridSpec(
            num_scalar_prefetch=0,
            grid=grid,
            in_specs=[
                pl.BlockSpec((tm, nsr), lambda i, j, k: (i, 0)),      # w rows
                pl.BlockSpec((tm, tk), lambda i, j, k: (i, k)),       # x
                pl.BlockSpec((tk, tn), lambda i, j, k: (k, j)),       # W^T
                pl.BlockSpec((1, tn), lambda i, j, k: (0, j)),        # bias
                pl.BlockSpec((din_p, nsr), lambda i, j, k: (0, 0)),   # A_all
                pl.BlockSpec((nsr, tn), lambda i, j, k: (0, j)),      # B_all
                pl.BlockSpec((nsr, nsr), lambda i, j, k: (0, 0)),     # mixer
            ],
            out_specs=pl.BlockSpec((tm, tn), lambda i, j, k: (i, j)),
            scratch_shapes=scratch_shapes,
        ),
        compiler_params=pltpu.CompilerParams(
            # z (and zb) scratch is carried across j, so j must be arbitrary;
            # the row axis stays parallel for the v7x megacore split.
            dimension_semantics=("parallel", "arbitrary", "arbitrary"),
            vmem_limit_bytes=vmem_limit),
    )(w_rows_p, x_p, wt_p, bias_p, a_p, b_p, mixer)

    return out_flat[:rows, :D_out].reshape(B, S, D_out)


# --------------------------------------------------------------------------
# SkilledMixin-equivalent wrapper (glue in plain JAX)
# --------------------------------------------------------------------------
def skilled_mixin_forward(task_ids, x, params, *, n_tasks, n_skills,
                          skilled_variant="learned", custom_skills=None,
                          scaling=4.0, tm=None, tn=None, tk=None):
    # get_skills(): choose the (n_tasks, n_skills) allocation matrix.
    if skilled_variant in ("learned", "hyper", "sparse"):
        skills = jax.nn.sigmoid(params["skill_logits"])   # eval-mode 'learned'
    elif skilled_variant == "shared":
        skills = jnp.ones((n_tasks, n_skills), jnp.float32)
    elif skilled_variant == "private":
        skills = jnp.eye(n_tasks, n_skills, dtype=jnp.float32)
    elif skilled_variant == "custom":
        skills = custom_skills
    else:
        raise ValueError(skilled_variant)

    # inform_layers(): per-example skill weights via task_ids gather (tiny).
    skill_weights = skills[task_ids]                      # (B, n_skills)

    return skilled_lora_forward(
        skill_weights, x,
        params["weight_t"], params["bias"],
        params["lora_A"], params["lora_B"],
        scaling=scaling, tm=tm, tn=tn, tk=tk,
    )


def _reference(task_ids, x, params, scaling):
    # Matches the kernel's quantization points (bf16 operands, bf16 zb cache);
    # math in f32.
    hp = jax.lax.Precision.HIGHEST
    bf = lambda t: t.astype(jnp.bfloat16).astype(jnp.float32)
    xq, wq = bf(x), bf(params["weight_t"])
    aq = bf(params["lora_A"])
    bq = bf(scaling * params["lora_B"])
    w = jax.nn.sigmoid(params["skill_logits"])[task_ids]            # (B, K)
    base = jnp.einsum("bsi,io->bso", xq, wq, precision=hp) + params["bias"]
    z = jnp.einsum("bsi,kir->bskr", xq, aq, precision=hp)           # per-skill
    z_mix = jnp.einsum("bk,bskr->bsr", w, z, precision=hp)
    z_b = bf(jnp.einsum("bk,bsr->bskr", w, z_mix))                  # w_s*z_mix
    lora = jnp.einsum("bskr,kro->bso", z_b, bq, precision=hp)
    return base + lora


if __name__ == "__main__":
    # Small, module-consistent shapes (big enough to exercise N/K tiling and
    # the j==0 z-reuse path).
    B, S, D_in, D_out = 2, 8, 256, 256
    n_tasks, n_skills, rank = 3, 4, 4
    lora_alpha = 16
    scaling = lora_alpha / rank

    key = jax.random.PRNGKey(0)
    k_x, k_w, k_b, k_a, k_bb, k_logits = jax.random.split(key, 6)

    x = jax.random.normal(k_x, (B, S, D_in), jnp.float32)
    task_ids = jnp.array([0, 2], dtype=jnp.int32)

    params = {
        # base Linear: stored pre-transposed (D_in, D_out)
        "weight_t": jax.random.normal(k_w, (D_in, D_out), jnp.float32)
                    * (1.0 / jnp.sqrt(D_in)),
        "bias": jax.random.normal(k_b, (1, D_out), jnp.float32) * 0.1,
        # LoRA params (B would be zero-init in training; small random values
        # here so the low-rank path is exercised).
        "lora_A": jax.random.normal(k_a, (n_skills, D_in, rank), jnp.float32)
                  * (1.0 / jnp.sqrt(D_in)),
        "lora_B": jax.random.normal(k_bb, (n_skills, rank, D_out), jnp.float32)
                  * 0.05,
        "skill_logits": jax.random.normal(k_logits, (n_tasks, n_skills),
                                          jnp.float32),
    }

    # Explicit tiles so the demo runs a real (rows, N, K) = (1, 2, 2) grid
    # (multiple j tiles -> exercises the scratch-carried z reuse).
    out = skilled_mixin_forward(task_ids, x, params,
                                n_tasks=n_tasks, n_skills=n_skills,
                                skilled_variant="learned", scaling=scaling,
                                tm=16, tn=128, tk=128)
    out = jax.block_until_ready(out)

    ref = _reference(task_ids, x, params, scaling)
    assert out.shape == (B, S, D_out)
    max_err = float(jnp.max(jnp.abs(out - ref)))
    # bf16 operands / f32 accumulation: tolerance covers matmul pass rounding.
    assert jnp.allclose(out, ref, atol=1e-2, rtol=1e-2), max_err

    print("KERNEL_OK")
</pallas_src>

<mosaic_0001>
module attributes {stable_mosaic.version = 11 : i64} {
  func.func @_skilled_lora_kernel(%arg0: i32, %arg1: i32, %arg2: i32, %arg3: memref<16x16xf32, #tpu.memory_space<vmem>>, %arg4: memref<16x128xbf16, #tpu.memory_space<vmem>>, %arg5: memref<128x128xbf16, #tpu.memory_space<vmem>>, %arg6: memref<1x128xf32, #tpu.memory_space<vmem>>, %arg7: memref<256x16xbf16, #tpu.memory_space<vmem>>, %arg8: memref<16x128xbf16, #tpu.memory_space<vmem>>, %arg9: memref<16x16xf32, #tpu.memory_space<vmem>>, %arg10: memref<16x128xf32, #tpu.memory_space<vmem>>, %arg11: memref<16x16xf32, #tpu.memory_space<vmem>>, %arg12: memref<16x16xbf16, #tpu.memory_space<vmem>>) attributes {dimension_semantics = [#tpu.dimension_semantics<parallel>, #tpu.dimension_semantics<arbitrary>, #tpu.dimension_semantics<arbitrary>], iteration_bounds = array<i64: 1, 2, 2>, scalar_prefetch = 0 : i64, scratch_operands = 2 : i64, tpu.core_type = #tpu.core_type<tc>, window_params = [{transform_indices = @transform_0, window_bounds = array<i64: 16, 16>}, {transform_indices = @transform_1, window_bounds = array<i64: 16, 128>}, {transform_indices = @transform_2, window_bounds = array<i64: 128, 128>}, {transform_indices = @transform_3, window_bounds = array<i64: 1, 128>}, {pipeline_mode = #tpu.pipeline_mode<synchronous>, transform_indices = @transform_4, window_bounds = array<i64: 256, 16>}, {transform_indices = @transform_5, window_bounds = array<i64: 16, 128>}, {pipeline_mode = #tpu.pipeline_mode<synchronous>, transform_indices = @transform_6, window_bounds = array<i64: 16, 16>}, {transform_indices = @transform_7, window_bounds = array<i64: 16, 128>}]} {
    %c0 = arith.constant 0 : index
    %c0_0 = arith.constant 0 : index
    %0 = vector.load %arg4[%c0, %c0_0] : memref<16x128xbf16, #tpu.memory_space<vmem>>, vector<16x128xbf16>
    %c0_i32 = arith.constant 0 : i32
    %1 = arith.cmpi eq, %arg2, %c0_i32 : i32
    %2 = arith.extui %1 : i1 to i32
    %c0_i32_1 = arith.constant 0 : i32
    %3 = arith.cmpi ne, %2, %c0_i32_1 : i32
    scf.if %3 {
      %c0_11 = arith.constant 0 : index
      %c0_12 = arith.constant 0 : index
      %15 = vector.load %arg6[%c0_11, %c0_12] : memref<1x128xf32, #tpu.memory_space<vmem>>, vector<1x128xf32>
      %16 = vector.shape_cast %15 : vector<1x128xf32> to vector<1x128xf32>
      %17 = vector.broadcast %16 : vector<1x128xf32> to vector<16x128xf32>
      %c0_13 = arith.constant 0 : index
      %c0_14 = arith.constant 0 : index
      %18 = vector.load %arg10[%c0_13, %c0_14] : memref<16x128xf32, #tpu.memory_space<vmem>>, vector<16x128xf32>
      tpu.vector_store %arg10[%c0_13, %c0_14], %17 {strides = array<i32>} : memref<16x128xf32, #tpu.memory_space<vmem>>, vector<16x128xf32>,
    } else {
    }
    %c0_2 = arith.constant 0 : index
    %c0_3 = arith.constant 0 : index
    %4 = vector.load %arg10[%c0_2, %c0_3] : memref<16x128xf32, #tpu.memory_space<vmem>>, vector<16x128xf32>
    %c0_4 = arith.constant 0 : index
    %c0_5 = arith.constant 0 : index
    %5 = vector.load %arg5[%c0_4, %c0_5] : memref<128x128xbf16, #tpu.memory_space<vmem>>, vector<128x128xbf16>
    %cst = arith.constant dense<0.000000e+00> : vector<16x128xf32>
    %6 = tpu.matmul %0, %5, %cst {dimension_numbers = #tpu.dot_dimension_numbers<[1], [0], [0], [1], [0, 0, 1, 1], [], []>} : vector<16x128xbf16>, vector<128x128xbf16>, vector<16x128xf32> -> vector<16x128xf32>
    %7 = arith.addf %4, %6 : vector<16x128xf32>
    %c0_6 = arith.constant 0 : index
    %c0_7 = arith.constant 0 : index
    %8 = vector.load %arg10[%c0_6, %c0_7] : memref<16x128xf32, #tpu.memory_space<vmem>>, vector<16x128xf32>
    tpu.vector_store %arg10[%c0_6, %c0_7], %7 {strides = array<i32>} : memref<16x128xf32, #tpu.memory_space<vmem>>, vector<16x128xf32>,
    %c0_i32_8 = arith.constant 0 : i32
    %9 = arith.cmpi eq, %arg1, %c0_i32_8 : i32
    %10 = arith.extui %9 : i1 to i32
    %c0_i32_9 = arith.constant 0 : i32
    %11 = arith.cmpi ne, %10, %c0_i32_9 : i32
    scf.if %11 {
      %c0_i32_11 = arith.constant 0 : i32
      %15 = arith.cmpi eq, %arg2, %c0_i32_11 : i32
      %16 = arith.extui %15 : i1 to i32
      %c0_i32_12 = arith.constant 0 : i32
      %17 = arith.cmpi ne, %16, %c0_i32_12 : i32
      scf.if %17 {
        %cst_21 = arith.constant 0.000000e+00 : f32
        %29 = vector.broadcast %cst_21 : f32 to vector<16x16xf32>
        %c0_22 = arith.constant 0 : index
        %c0_23 = arith.constant 0 : index
        %30 = vector.load %arg11[%c0_22, %c0_23] : memref<16x16xf32, #tpu.memory_space<vmem>>, vector<16x16xf32>
        tpu.vector_store %arg11[%c0_22, %c0_23], %29 {strides = array<i32>} : memref<16x16xf32, #tpu.memory_space<vmem>>, vector<16x16xf32>,
      } else {
      }
      %c128_i32 = arith.constant 128 : i32
      %18 = arith.muli %arg2, %c128_i32 : i32
      %19 = tpu.assume_multiple %18, 128 : i32
      %c0_13 = arith.constant 0 : index
      %c0_14 = arith.constant 0 : index
      %20 = vector.load %arg11[%c0_13, %c0_14] : memref<16x16xf32, #tpu.memory_space<vmem>>, vector<16x16xf32>
      %21 = arith.index_cast %19 : i32 to index
      %c0_15 = arith.constant 0 : index
      %22 = vector.load %arg7[%21, %c0_15] : memref<256x16xbf16, #tpu.memory_space<vmem>>, vector<128x16xbf16>
      %cst_16 = arith.constant dense<0.000000e+00> : vector<16x16xf32>
      %23 = tpu.matmul %0, %22, %cst_16 {dimension_numbers = #tpu.dot_dimension_numbers<[1], [0], [0], [1], [0, 0, 1, 1], [], []>} : vector<16x128xbf16>, vector<128x16xbf16>, vector<16x16xf32> -> vector<16x16xf32>
      %24 = arith.addf %20, %23 : vector<16x16xf32>
      %c0_17 = arith.constant 0 : index
      %c0_18 = arith.constant 0 : index
      %25 = vector.load %arg11[%c0_17, %c0_18] : memref<16x16xf32, #tpu.memory_space<vmem>>, vector<16x16xf32>
      tpu.vector_store %arg11[%c0_17, %c0_18], %24 {strides = array<i32>} : memref<16x16xf32, #tpu.memory_space<vmem>>, vector<16x16xf32>,
      %c1_i32_19 = arith.constant 1 : i32
      %26 = arith.cmpi eq, %arg2, %c1_i32_19 : i32
      %27 = arith.extui %26 : i1 to i32
      %c0_i32_20 = arith.constant 0 : i32
      %28 = arith.cmpi ne, %27, %c0_i32_20 : i32
      scf.if %28 {
        %c0_21 = arith.constant 0 : index
        %c0_22 = arith.constant 0 : index
        %29 = vector.load %arg3[%c0_21, %c0_22] : memref<16x16xf32, #tpu.memory_space<vmem>>, vector<16x16xf32>
        %c0_23 = arith.constant 0 : index
        %c0_24 = arith.constant 0 : index
        %30 = vector.load %arg11[%c0_23, %c0_24] : memref<16x16xf32, #tpu.memory_space<vmem>>, vector<16x16xf32>
        %31 = arith.mulf %30, %29 : vector<16x16xf32>
        %c0_25 = arith.constant 0 : index
        %c0_26 = arith.constant 0 : index
        %32 = vector.load %arg9[%c0_25, %c0_26] : memref<16x16xf32, #tpu.memory_space<vmem>>, vector<16x16xf32>
        %cst_27 = arith.constant dense<0.000000e+00> : vector<16x16xf32>
        %33 = tpu.matmul %31, %32, %cst_27 {dimension_numbers = #tpu.dot_dimension_numbers<[1], [0], [0], [1], [0, 0, 1, 1], [], []>} : vector<16x16xf32>, vector<16x16xf32>, vector<16x16xf32> -> vector<16x16xf32>
        %34 = arith.mulf %33, %29 : vector<16x16xf32>
        %35 = arith.truncf %34 : vector<16x16xf32> to vector<16x16xbf16>
        %c0_28 = arith.constant 0 : index
        %c0_29 = arith.constant 0 : index
        %36 = vector.load %arg12[%c0_28, %c0_29] : memref<16x16xbf16, #tpu.memory_space<vmem>>, vector<16x16xbf16>
        tpu.vector_store %arg12[%c0_28, %c0_29], %35 {strides = array<i32>} : memref<16x16xbf16, #tpu.memory_space<vmem>>, vector<16x16xbf16>,
      } else {
      }
    } else {
    }
    %c1_i32 = arith.constant 1 : i32
    %12 = arith.cmpi eq, %arg2, %c1_i32 : i32
    %13 = arith.extui %12 : i1 to i32
    %c0_i32_10 = arith.constant 0 : i32
    %14 = arith.cmpi ne, %13, %c0_i32_10 : i32
    scf.if %14 {
      %c0_11 = arith.constant 0 : index
      %c0_12 = arith.constant 0 : index
      %15 = vector.load %arg12[%c0_11, %c0_12] : memref<16x16xbf16, #tpu.memory_space<vmem>>, vector<16x16xbf16>
      %c0_13 = arith.constant 0 : index
      %c0_14 = arith.constant 0 : index
      %16 = vector.load %arg8[%c0_13, %c0_14] : memref<16x128xbf16, #tpu.memory_space<vmem>>, vector<16x128xbf16>
      %cst_15 = arith.constant dense<0.000000e+00> : vector<16x128xf32>
      %17 = tpu.matmul %15, %16, %cst_15 {dimension_numbers = #tpu.dot_dimension_numbers<[1], [0], [0], [1], [0, 0, 1, 1], [], []>} : vector<16x16xbf16>, vector<16x128xbf16>, vector<16x128xf32> -> vector<16x128xf32>
      %c0_16 = arith.constant 0 : index
      %c0_17 = arith.constant 0 : index
      %18 = vector.load %arg10[%c0_16, %c0_17] : memref<16x128xf32, #tpu.memory_space<vmem>>, vector<16x128xf32>
      %19 = arith.addf %18, %17 : vector<16x128xf32>
      %c0_18 = arith.constant 0 : index
      %c0_19 = arith.constant 0 : index
      %20 = vector.load %arg10[%c0_18, %c0_19] : memref<16x128xf32, #tpu.memory_space<vmem>>, vector<16x128xf32>
      tpu.vector_store %arg10[%c0_18, %c0_19], %19 {strides = array<i32>} : memref<16x128xf32, #tpu.memory_space<vmem>>, vector<16x128xf32>,
    } else {
    }
    return
  }
  func.func @transform_0(%arg0: i32, %arg1: i32, %arg2: i32) -> (i32, i32) {
    %c0_i32 = arith.constant 0 : i32
    %c0_i32_0 = arith.constant 0 : i32
    return %arg0, %c0_i32 : i32, i32
  }
  func.func @transform_1(%arg0: i32, %arg1: i32, %arg2: i32) -> (i32, i32) {
    %c0_i32 = arith.constant 0 : i32
    return %arg0, %arg2 : i32, i32
  }
  func.func @transform_2(%arg0: i32, %arg1: i32, %arg2: i32) -> (i32, i32) {
    %c0_i32 = arith.constant 0 : i32
    return %arg2, %arg1 : i32, i32
  }
  func.func @transform_3(%arg0: i32, %arg1: i32, %arg2: i32) -> (i32, i32) {
    %c0_i32 = arith.constant 0 : i32
    %c0_i32_0 = arith.constant 0 : i32
    return %c0_i32, %arg1 : i32, i32
  }
  func.func @transform_4(%arg0: i32, %arg1: i32, %arg2: i32) -> (i32, i32) {
    %c0_i32 = arith.constant 0 : i32
    %c0_i32_0 = arith.constant 0 : i32
    %c0_i32_1 = arith.constant 0 : i32
    return %c0_i32, %c0_i32_0 : i32, i32
  }
  func.func @transform_5(%arg0: i32, %arg1: i32, %arg2: i32) -> (i32, i32) {
    %c0_i32 = arith.constant 0 : i32
    %c0_i32_0 = arith.constant 0 : i32
    return %c0_i32, %arg1 : i32, i32
  }
  func.func @transform_6(%arg0: i32, %arg1: i32, %arg2: i32) -> (i32, i32) {
    %c0_i32 = arith.constant 0 : i32
    %c0_i32_0 = arith.constant 0 : i32
    %c0_i32_1 = arith.constant 0 : i32
    return %c0_i32, %c0_i32_0 : i32, i32
  }
  func.func @transform_7(%arg0: i32, %arg1: i32, %arg2: i32) -> (i32, i32) {
    %c0_i32 = arith.constant 0 : i32
    return %arg0, %arg1 : i32, i32
  }
}

</mosaic_0001>

<bundles_post_ra>
// kernel: tpu_custom_call.1
= control target key start
LH: loop header
LB: loop body
LE: loop exit
PB: predicated region body
PF: predicated region fallthrough
CT: control target
= control target key end

     0   :  { %s1918_s0 = inlined_call_operand.vmem [shape: f32[16,16], index: 0, kind: input, shape index: {}]   ;;  %s1919_s1 = inlined_call_operand.vmem [shape: bf16[16,256], index: 1, kind: input, shape index: {}]   ;;  %s1920_s2 = inlined_call_operand.hbm [shape: bf16[256,256], index: 2, kind: input, shape index: {}]   ;;  %s1921_s3 = inlined_call_operand.vmem [shape: f32[1,256], index: 3, kind: input, shape index: {}]   ;;  %s1922_s4 = inlined_call_operand.vmem [shape: bf16[256,16], index: 4, kind: input, shape index: {}]   ;;  %s1923_s5 = inlined_call_operand.vmem [shape: bf16[16,256], index: 5, kind: input, shape index: {}]   ;;  %s1924_s6 = inlined_call_operand.vmem [shape: f32[16,16], index: 6, kind: input, shape index: {}]   ;;  %s1925_s7 = inlined_call_operand.hbm [shape: f32[16,256], index: 7, kind: output, shape index: {}]  }
   0x1   :  { %1936 = sst [smem:[#allocation21_spill]] %s1918_s0 }
   0x2   :  { %1937 = sst [smem:[#allocation22_spill]] %s1919_s1 }
   0x3   :  { %1938 = sst [smem:[#allocation23_spill]] %s1922_s4 }
   0x4   :  { %1939 = sst [smem:[#allocation24_spill]] %s1924_s6 }
   0x5   :  { %1940 = sst [smem:[#allocation25_spill]] %s1925_s7 }
   0x6   :  { %12 = vsyncpa [#allocation6], 0 }
   0x7   :  { %14 = vsyncpa [#allocation6 + $0x1], 0 }
   0x8   :  { %15 = vsyncpa [#allocation7], 0 }
   0x9   :  { %17 = vsyncpa [#allocation7 + $0x1], 0  ;;  %s1604_s24 = smov 0   ;;  %s1606_s25 = smov 0  }
   0xa   :  { %s1608_s26 = smov 0   ;;  %s1610_s27 = smov 0  }
   0xb   :  { %s1612_s28 = smov 0   ;;  %s1614_s29 = smov 0  }
   0xc   :  { %s1616_s30 = smov 0   ;;  %s1618_s8 = smov 0  }
   0xd   :  { %s1620_s9 = smov 0   ;;  %s1622_s10 = smov 0  }
   0xe   :  { %s1624_s11 = smov 0   ;;  %s1626_s12 = smov 0  }
   0xf   :  { %s1628_s13 = smov 0  }
  0x10 LB: > { %1941 = sst [smem:[#allocation12_spill]] %s1499_s24  ;;  %s35_s16 = sadd.s32 1, %s1539_s11  ;;  %s1547_s13 = sphi %s1628_s13, %s23_s13   ;;  %s1543_s12 = sphi %s1626_s12, %s1984_s12   ;;  %s1539_s11 = sphi %s1624_s11, %s1983_s11   ;;  %s1535_s10 = sphi %s1622_s10, %s1982_s10   ;;  %s1531_s9 = sphi %s1620_s9, %s1981_s9   ;;  %s1527_s8 = sphi %s1618_s8, %s1980_s8   ;;  %s1523_s30 = sphi %s1616_s30, %s1970_s30   ;;  %s1519_s29 = sphi %s1614_s29, %s1979_s29   ;;  %s1515_s28 = sphi %s1612_s28, %s1978_s28   ;;  %s1511_s27 = sphi %s1610_s27, %s1977_s27   ;;  %s1507_s26 = sphi %s1608_s26, %s1976_s26   ;;  %s1503_s25 = sphi %s1606_s25, %s1975_s25   ;;  %s1499_s24 = sphi %s1604_s24, %s1974_s24  }
  0x11   : > { %1942 = sst [smem:[#allocation13_spill]] %s1527_s8  ;;  %s38_s17 = sadd.s32 1, %s1543_s12 }
  0x12   : > { %p36_p0 = scmp.ge.s32.totalorder %s35_s16, 2  ;;  %s77_s18 = sadd.s32 1, %s1527_s8 }
  0x13   : > { %p84_p1 = scmp.ne.s32.totalorder %s1527_s8, %s1523_s30  ;;  %p85_p2 = scmp.eq.s32.totalorder %s1547_s13, 0 }
  0x14   : > { %s1986_s16 = smov (%p36_p0, %s35_s16), 0  ;;  %s1988_s17 = smov (!%p36_p0, %s38_s17), %s1543_s12 }
  0x15   : > { %1943 = sst [smem:[#allocation14_spill]] %s1986_s16  ;;  %s73_s19 = ssub.s32 %s1539_s11, %s1986_s16 }
  0x16   : > { %p1684_p3 = por %p85_p2, %p84_p1  ;;  %p40_p4 = scmp.ge.s32.totalorder %s1988_s17, 2 }
  0x17   : > { %p75_p5 = scmp.eq.s32.totalorder %s73_s19, 0  ;;  %s105_s21 = sadd.s32 1, %s1519_s29 }
  0x18   : > { %p112_p6 = scmp.ne.s32.totalorder %s1519_s29, %s1515_s28  ;;  %s1990_s17 = smov (%p40_p4, %s1988_s17), 0 }
  0x19   : > { %1945 = sst [smem:[#allocation15_spill]] %s1990_s17  ;;  %s101_s23 = ssub.s32 %s1543_s12, %s1990_s17 }
  0x1a   : > { %s1694_s22 = scalar_select %p75_p5, %s1527_s8, %s77_s18  }
  0x1b   : > { %p1700_p7 = por %p112_p6, %p85_p2  ;;  %s102_s14 = sor.u32 %s101_s23, %s73_s19 }
  0x1c   : > { %1946 = sst [smem:[#allocation16_spill]] %s1694_s22  ;;  %p118_p8 = scmp.ne.s32.totalorder %s1515_s28, %s1511_s27 }
  0x1d   : > { %p103_p9 = scmp.eq.s32.totalorder %s102_s14, 0  ;;  %s1948_s16 = sadd.s32 4294967295, %s1547_s13  }
  0x1e   : > { %p119_p10 = scmp.eq.s32.totalorder %s1948_s16, 0  ;;  %p176_p11 = scmp.eq.s32.totalorder %s101_s23, 0 }
  0x1f   : > { %s178_s7 = sadd.s32 1, %s1507_s26  ;;  %p185_p13 = scmp.ne.s32.totalorder %s1507_s26, %s1503_s25 }
  0x20   : > { %s1710_s0 = scalar_select %p103_p9, %s1519_s29, %s105_s21  }
  0x21   : > { %p1712_p12 = por %p119_p10, %p118_p8  ;;  %p1723_p0 = por %p185_p13, %p85_p2 }
  0x22   : > { %1949 = sst [smem:[#allocation17_spill]] %s1710_s0  ;;  %s1953_s27 = smov %s1948_s16 }
  0x23   : > { %s1719_s18 = scalar_select %p176_p11, %s1507_s26, %s178_s7  }
  0x24   : > { %p238_p1 = scmp.eq.s32.totalorder %s1953_s27, 3  ;;  %p243_p4 = scmp.ne.s32.totalorder %s1503_s25, %s1499_s24 }
  0x25   : > { %1951 = sst [smem:[#allocation18_spill]] %s1719_s18  ;;  %s1954_s14 = sadd.s32 4294967294, %s1547_s13  }
  0x26   : > { %p244_p5 = scmp.eq.s32.totalorder %s1954_s14, 3  ;;  %p1733_p6 = por %p238_p1, %p185_p13 }
  0x27   : > { %p1111_p9 = scmp.ge.s32.totalorder %s1547_s13, 4 }
  0x28   : > { %s1955_s16 = scalar_select %p1733_p6, 1, 0 }
  0x29   : > { %p1737_p8 = por %p244_p5, %p243_p4  ;;  %275 = sbr.rel (%p1111_p9) target bundleno = 79 (0x4f), region = 28 }
  0x2a   : > { %1956 = sst [smem:[#allocation19_spill]] %s1955_s16 }
  0x2b   : > { %s1957_s19 = scalar_select %p1737_p8, 1, 0 }
  0x2d   : > { %1958 = sst [smem:[#allocation20_spill]] %s1957_s19 }
  0x2e   : > { %278 = sbr.rel (!%p1684_p3) target bundleno = 57 (0x39), region = 32  ;;  %s280_s7 = sand.u32 (%p1684_p3), 1, %s1527_s8  }
  0x2f   : > { %s1113_s21 = sshll.u32 (%p1684_p3), %s1539_s11, 2  ;;  %s1112_s23 = sshll.u32 (%p1684_p3), %s280_s7, 3 }
  0x30   : > { %s1959_s1 = sld [smem:[#allocation22_spill]] (%p1684_p3)  ;;  %s282_s0 = scalar_lea.vmem (%p1684_p3), [#allocation4], %s1112_s23 }
  0x36   : > { %s287_s22 = scalar_lea.vmem %s1959_s1, %s1113_s21 }
  0x37   : > { %v304_v0 = vld [vmem:[%s287_s22] sm:$0xf]  ;;  %v306_v1 = vld [vmem:[%s287_s22 + $0x8] sm:$0xf] }
  0x38   : > { %305 = vst [vmem:[%s282_s0] sm:$0xf] %v304_v0  ;;  %307 = vst [vmem:[%s282_s0 + $0x4] sm:$0xf] %v306_v1 }
  0x39 PF: > { %s336_s20 = sand.u32 1, %s1519_s29   ;;  %s1161_s18 = sshll.u32 %s1539_s11, 5 }
  0x3a   : > { %s1114_s19 = sshll.u32 %s336_s20, 6  ;;  %s346_s8 = sadd.s32 %s1543_s12, %s1161_s18 }
  0x3b   : > { %s1117_s24 = sshll.u32 %s346_s8, 6  ;;  %s340_s7 = scalar_lea.vmem [#allocation5], %s1114_s19 }
  0x3c   : > { %s349_s16 = sshll.u32 %s340_s7, 4  ;;  %s348_s21 = scalar_lea.hbm %s1920_s2, %s1117_s24  ;;  %s350_s16 = int_to_ptr.vmem [resolvable:$true] %s349_s16 }
  0x3d   : > { %s337_s22 = scalar_lea.sflag [#allocation6], %s336_s20  ;;  %s1397_s23 = scalar_lea.vmem %s350_s16, 1024 }
  0x3e   : > { %p1398_p2 = scmp.ne.s32.totalorder %s350_s16, %s1397_s23  ;;  %s1549_s0 = smov [#allocation5]  }
  0x3f   : > { %s1401_s14 = sshll.u32 %s1549_s0, 4  ;;  %s1402_s14 = int_to_ptr.vmem [resolvable:$false] %s1401_s14 }
  0x40   : > { %p1399_p3 = pnand %p1398_p2, %p1700_p7  ;;  %s1403_s1 = scalar_lea.vmem %s1402_s14, 2048 }
  0x41   : > { %p1404_p11 = scmp.lt.s32.totalorder %s350_s16, %s1402_s14  ;;  %p1405_p13 = scmp.lt.s32.totalorder %s1403_s1, %s1397_s23 }
  0x42   : > { %p1400_p10 = pneg %p1399_p3 }
  0x43   : > { %p1406_p1 = por %p1405_p13, %p1404_p11 }
  0x45   : > { %p1407_p4 = pnand %p1406_p1, %p1400_p10 }
  0x47   : > { %1410 = shalt.err (!%p1407_p4)
}
  0x48   : > { %s1550_s8 = smov 128   ;;  %s1551_s4 = smov 64  }
  0x49   : > { %s1552_s24 = smov 4   ;;  %364 = sbr.rel (!%p1723_p0) target bundleno = 79 (0x4f), region = 81 }
  0x4a   : > { %1241 = dma.hbm_to_vmem [thread:$0]  (%p1700_p7), %s348_s21, 1024, %s350_s16, %s337_s22, %s1550_s8, %s1551_s4, %s1552_s24  }
  0x4b   : > { %s366_s18 = sand.u32 (%p1723_p0), 1, %s1507_s26   ;;  %s1119_s19 = sshll.u32 (%p1723_p0), %s1543_s12, 2 }
  0x4c   : > { %s1118_s20 = sshll.u32 (%p1723_p0), %s366_s18, 3  ;;  %s370_s1 = scalar_lea.vmem (%p1723_p0), %s1923_s5, %s1119_s19 }
  0x4d   : > { %v387_v2 = vld [vmem:[%s370_s1] sm:$0xf] (%p1723_p0)  ;;  %v389_v3 = vld [vmem:[%s370_s1 + $0x8] sm:$0xf] (%p1723_p0)  ;;  %s368_s23 = scalar_lea.vmem (%p1723_p0), [#allocation8], %s1118_s20 }
  0x4e   : > { %388 = vst [vmem:[%s368_s23] sm:$0xf] %v387_v2  ;;  %390 = vst [vmem:[%s368_s23 + $0x4] sm:$0xf] %v389_v3 }
  0x4f PF: > { %p1120_p7 = scmp.ge.s32.totalorder %s1547_s13, 1  ;;  %p417_p0 = scmp.lt.s32.totalorder %s1547_s13, 5 }
  0x51   : > { %p418_p5 = pnand %p1120_p7, %p417_p0 }
  0x52   : > { %s424_s15 = sand.u32 (!%p418_p5), 1, %s1523_s30   ;;  %s430_s17 = sand.u32 (!%p418_p5), 1, %s1515_s28  }
  0x53   : > { %421 = sbr.rel (%p418_p5) target bundleno = 1027 (0x403), region = 122  ;;  %s1121_s16 = sshll.u32 (!%p418_p5), %s424_s15, 3 }
  0x54   : > { %s1122_s21 = sshll.u32 (!%p418_p5), %s430_s17, 6  ;;  %s426_s22 = scalar_lea.vmem (!%p418_p5), [#allocation4], %s1121_s16 }
  0x55   : > { %s431_s0 = scalar_lea.sflag (!%p418_p5), [#allocation6], %s430_s17  ;;  %s1770_s14 = scalar_lea.vmem (!%p418_p5), [#allocation5], %s1122_s21 }
  0x58   : > { %1490 = dma.done.wait (%p1712_p12), %s431_s0, 1024  }
  0x59   : > { %1492 = vsyncadd (%p1712_p12), %s431_s0, 4294966272  ;;  %s1777_s8 = sand.u32 1, %s1503_s25   ;;  %p496_p9 = scmp.lt.s32.totalorder %s1535_s10, 1  ;;  %v501_v4 = vld [vmem:[%s426_s22] sm:$0xf] }
  0x5a   : > { %s1123_s30 = sshll.u32 %s1777_s8, 3  ;;  %s1124_s4 = sshll.u32 %s1777_s8, 4  ;;  %v502_v5 = vld [vmem:[%s426_s22 + $0x4] sm:$0xf] }
  0x5b   : > { %s497_s24 = scalar_select %p496_p9, %s1535_s10, 1 }
  0x5c   : > { %s1786_s7 = scalar_lea.vmem [#allocation8], %s1123_s30  ;;  %s1788_s6 = scalar_lea.vmem [#allocation9], %s1124_s4 }
  0x5d   : > { %s498_s20 = scalar_lea.vmem %s1921_s3, %s497_s24  ;;  %p1125_p12 = scmp.ne.s32.totalorder %s1531_s9, 0 }
  0x5f   : > { %506 = sbr.rel (%p1125_p12) target bundleno = 102 (0x66), region = 138 }
  0x64   : > { %v1126_v6 = vld [vmem:[%s498_s20] ss:$0 sm:$0xff] }
  0x65   : > { %514 = vst [vmem:[%s1788_s6] sm:$0xff] %v1126_v6  ;;  %515 = vst [vmem:[%s1788_s6 + $0x8] sm:$0xff] %v1126_v6 }
  0x66 PF: > { %v1367_v7 = vld [vmem:[%s1770_s14 + $0x38] sm:$0xff]   ;;  %v1553_v8 = vmov 0.0   ;;  %v1368_v9 = vld [vmem:[%s1770_s14 + $0x30] sm:$0xff]   ;;  %vm1554_vm0 = vmmov 0   ;;  %v1369_v10 = vld [vmem:[%s1770_s14 + $0x28] sm:$0xff]   ;;  %v1127_v16 = vcombine.low %v501_v4, %v502_v5  ;;  %p1136_p2 = scmp.ne.s32.totalorder %s1535_s10, 0 }
  0x67   : > { %1188 = vmatprep.subr.bf16.mxu0 %v1553_v8  ;;  %1204 = vmatprep.mubr.msk.bf16.mxu0 %vm1554_vm0, %v1553_v8  ;;  %v1370_v11 = vld [vmem:[%s1770_s14 + $0x20] sm:$0xff]   ;;  %v1371_v12 = vld [vmem:[%s1770_s14 + $0x18] sm:$0xff]   ;;  %v1372_v13 = vld [vmem:[%s1770_s14 + $0x10] sm:$0xff]  }
  0x68   : > { %1189 = vmatpush3.bf16.msra.mxu0 %v1367_v7  ;;  %v1373_v14 = vld [vmem:[%s1770_s14 + $0x8] sm:$0xff]   ;;  %v1374_v15 = vld [vmem:[%s1770_s14] sm:$0xff]  }
  0x69   : > { %1190 = vmatprep.subr.bf16.mxu0 %v1553_v8 }
  0x6c   : > { %1191 = vmatpush3.bf16.msra.mxu0 %v1368_v9  ;;  %v516_v17 = vld [vmem:[%s1788_s6] sm:$0xff]  ;;  %v517_v21 = vld [vmem:[%s1788_s6 + $0x8] sm:$0xff] }
  0x6d   : > { %1192 = vmatprep.subr.bf16.mxu0 %v1553_v8 }
  0x70   : > { %1193 = vmatpush3.bf16.msra.mxu0 %v1369_v10 }
  0x71   : > { %1194 = vmatprep.subr.bf16.mxu0 %v1553_v8 }
  0x74   : > { %1195 = vmatpush3.bf16.msra.mxu0 %v1370_v11 }
  0x75   : > { %1196 = vmatprep.subr.bf16.mxu0 %v1553_v8 }
  0x78   : > { %1197 = vmatpush3.bf16.msra.mxu0 %v1371_v12 }
  0x79   : > { %1198 = vmatprep.subr.bf16.mxu0 %v1553_v8 }
  0x7c   : > { %1199 = vmatpush3.bf16.msra.mxu0 %v1372_v13 }
  0x7d   : > { %1200 = vmatprep.subr.bf16.mxu0 %v1553_v8 }
  0x80   : > { %1201 = vmatpush3.bf16.msra.mxu0 %v1373_v14 }
  0x81   : > { %1202 = vmatprep.subr.bf16.mxu0 %v1553_v8 }
  0x84   : > { %1203 = vmatpush3.bf16.msra.mxu0 %v1374_v15 }
  0x87   : > { %1205 = vmatmul.mubr.bf16.vlgmr.msra.gmra.mxu0 %v1127_v16 }
 0x147   : > { %v622_v18 = vpop.f32.mrf.mxu0 }
 0x148   : > { %v629_v19 = vadd.f32 %v622_v18, %v516_v17 }
 0x149   : > { %v1206_v20 = vpop.f32.mrf.mxu0 }
 0x14a   : > { %631 = vst [vmem:[%s1788_s6] sm:$0xff] %v629_v19  ;;  %636 = sbr.rel (%p1136_p2) target bundleno = 790 (0x316), region = 142 }
 0x14b   : > { %v625_v22 = vpop.f32.mrf.mxu0 }
 0x14c   : > { %v630_v23 = vadd.f32 %v625_v22, %v517_v21 }
 0x14d   : > { %v1207_v24 = vpop.f32.mrf.mxu0 }
 0x14e   : > { %632 = vst [vmem:[%s1788_s6 + $0x8] sm:$0xff] %v630_v23 }
 0x14f   : > { %639 = sbr.rel (%p1125_p12) target bundleno = 342 (0x156), region = 146 }
 0x154   : > { %vm640_vm1 = vcmask 130048   ;;  %v1555_v25 = vmov 0.0  }
 0x155   : > { %641 = vst.msk [vmem:[#allocation2] sm:$0xff] %vm640_vm1, %v1555_v25  ;;  %642 = vst.msk [vmem:[#allocation2 + $0x8] sm:$0xff] %vm640_vm1, %v1555_v25 }
 0x156 PF: > { %s1138_s27 = sshll.u32 %s1531_s9, 7  ;;  %v1556_v26 = vmov 0.0   ;;  %vm1557_vm2 = vmmov 0   ;;  %s1960_s16 = sld [smem:[#allocation23_spill]]  ;;  %vm757_vm3 = vcmask 130048  }
 0x157   : > { %1208 = vmatprep.subr.bf16.mxu0 %v1556_v26  ;;  %s646_s1 = sshra.s32 %s1138_s27, 3  ;;  %1224 = vmatprep.mubr.msk.bf16.mxu0 %vm1557_vm2, %v1556_v26  ;;  %p1148_p3 = scmp.ne.s32.totalorder %s1531_s9, 1 }
 0x158   : > { %s1139_s23 = sshll.u32 %s646_s1, 2  ;;  %s1961_s14 = sld [smem:[#allocation24_spill]] (!%p1148_p3) }
 0x159   : > { %s1962_s19 = sld [smem:[#allocation21_spill]] (!%p1148_p3) }
 0x15c   : > { %s649_s21 = scalar_lea.vmem %s1960_s16, %s1139_s23  ;;  %v644_v35 = vld [vmem:[#allocation2] sm:$0xff]  ;;  %v645_v39 = vld [vmem:[#allocation2 + $0x8] sm:$0xff] }
 0x15d   : > { %v1375_v27 = vld [vmem:[%s649_s21 + $0x38] sm:$0xff]   ;;  %v1376_v28 = vld [vmem:[%s649_s21 + $0x30] sm:$0xff]   ;;  %v1377_v29 = vld [vmem:[%s649_s21 + $0x28] sm:$0xff]  }
 0x15e   : > { %1209 = vmatpush3.bf16.msra.mxu0 %v1375_v27  ;;  %v1378_v30 = vld [vmem:[%s649_s21 + $0x20] sm:$0xff]   ;;  %v1379_v31 = vld [vmem:[%s649_s21 + $0x18] sm:$0xff]   ;;  %v1380_v32 = vld [vmem:[%s649_s21 + $0x10] sm:$0xff]  }
 0x15f   : > { %1210 = vmatprep.subr.bf16.mxu0 %v1556_v26  ;;  %v1381_v33 = vld [vmem:[%s649_s21 + $0x8] sm:$0xff]   ;;  %v1382_v34 = vld [vmem:[%s649_s21] sm:$0xff]  }
 0x162   : > { %1211 = vmatpush3.bf16.msra.mxu0 %v1376_v28 }
 0x163   : > { %1212 = vmatprep.subr.bf16.mxu0 %v1556_v26 }
 0x166   : > { %1213 = vmatpush3.bf16.msra.mxu0 %v1377_v29 }
 0x167   : > { %1214 = vmatprep.subr.bf16.mxu0 %v1556_v26 }
 0x16a   : > { %1215 = vmatpush3.bf16.msra.mxu0 %v1378_v30 }
 0x16b   : > { %1216 = vmatprep.subr.bf16.mxu0 %v1556_v26 }
 0x16e   : > { %1217 = vmatpush3.bf16.msra.mxu0 %v1379_v31 }
 0x16f   : > { %1218 = vmatprep.subr.bf16.mxu0 %v1556_v26 }
 0x172   : > { %1219 = vmatpush3.bf16.msra.mxu0 %v1380_v32 }
 0x173   : > { %1220 = vmatprep.subr.bf16.mxu0 %v1556_v26 }
 0x176   : > { %1221 = vmatpush3.bf16.msra.mxu0 %v1381_v33 }
 0x177   : > { %1222 = vmatprep.subr.bf16.mxu0 %v1556_v26 }
 0x17a   : > { %1223 = vmatpush3.bf16.msra.mxu0 %v1382_v34 }
 0x17d   : > { %1225 = vmatmul.mubr.bf16.vlgmr.msra.gmra.mxu0 %v1127_v16 }
 0x23d   : > { %v748_v36 = vpop.f32.mrf.mxu0 }
 0x23e   : > { %v755_v37 = vadd.f32 %v748_v36, %v644_v35 }
 0x23f   : > { %v1226_v38 = vpop.f32.mrf.mxu0 }
 0x240   : > { %758 = vst.msk [vmem:[#allocation2] sm:$0xff] %vm757_vm3, %v755_v37  ;;  %763 = sbr.rel (%p1148_p3) target bundleno = 790 (0x316), region = 150 }
 0x241   : > { %v751_v40 = vpop.f32.mrf.mxu0 }
 0x242   : > { %v756_v41 = vadd.f32 %v751_v40, %v645_v39 }
 0x243   : > { %v1227_v42 = vpop.f32.mrf.mxu0 }
 0x244   : > { %759 = vst.msk [vmem:[#allocation2 + $0x8] sm:$0xff] %vm757_vm3, %v756_v41 }
 0x245   : > { %v771_v43 = vld [vmem:[%s1961_s14 + $0x8] sm:$0xff]  ;;  %v770_v44 = vld [vmem:[%s1961_s14] sm:$0xff]  ;;  %vm863_vm4 = vcmask 125952  }
 0x246   : > { %v764_v45 = vld [vmem:[%s1962_s19] sm:$0xff]  ;;  %1228 = vmatprep.subr.mxu0 %v771_v43  ;;  %v765_v47 = vld [vmem:[%s1962_s19 + $0x8] sm:$0xff] }
 0x247   : > { %v766_v46 = vld [vmem:[#allocation2] sm:$0xff]  ;;  %1229 = vmatpush3.msra.mxu0 %v771_v43 }
 0x248   : > { %v768_v49 = vmul.f32 %v766_v46, %v764_v45  ;;  %1230 = vmatprep.subr.mxu0 %v770_v44 }
 0x249   : > { %1231 = vmatpush3.msra.mxu0 %v770_v44 }
 0x24a   : > { %1232 = vmatprep.mubr.msk.f32.mxu0 %vm757_vm3, %v768_v49 }
 0x24b   : > { %v767_v48 = vld [vmem:[#allocation2 + $0x8] sm:$0xff] }
 0x24c   : > { %v769_v50 = vmul.f32 %v767_v48, %v765_v47 }
 0x24e   : > { %1233 = vmatmul.mubr.msk.f32.vlgmr.msra.gmra.mxu0 %vm757_vm3, %v769_v50 }
 0x30e   : > { %v1234_v51 = vpop.f32.mrf.mxu0 }
 0x30f   : > { %v854_v52 = vmul.f32 %v1234_v51, %v765_v47 }
 0x310   : > { %v844_v53 = vpop.f32.mrf.mxu0 }
 0x311   : > { %v1163_v54 = vpack.c.bf16 %v854_v52, %v854_v52  ;;  %v853_v55 = vmul.f32 %v844_v53, %v764_v45 }
 0x313   : > { %865 = vst.msk [vmem:[#allocation3 + $0x4] sm:$0xf] %vm863_vm4, %v1163_v54  ;;  %v1162_v56 = vpack.c.bf16 %v853_v55, %v853_v55 }
 0x315   : > { %864 = vst.msk [vmem:[#allocation3] sm:$0xf] %vm863_vm4, %v1162_v56 }
 0x316 PF: > { %p1153_p10 = scmp.ne.s32.totalorder %s1531_s9, 1 }
 0x318   : > { %869 = sbr.rel (%p1153_p10) target bundleno = 1002 (0x3ea), region = 154 }
 0x31d   : > { %v1383_v57 = vld [vmem:[%s1786_s7] sm:$0xff]   ;;  %v1558_v58 = vmov 0.0   ;;  %vm1559_vm5 = vmmov 0   ;;  %vm885_vm6 = vcmask 130048   ;;  %v930_v60 = vld [vmem:[%s1788_s6] sm:$0xff] }
 0x31e   : > { %1235 = vmatprep.subr.bf16.mxu0 %v1558_v58  ;;  %v1384_v59 = vld [vmem:[#allocation3] sm:$0xff]   ;;  %1237 = vmatprep.mubr.msk.bf16.mxu0 %vm1559_vm5, %v1558_v58 }
 0x31f   : > { %1236 = vmatpush3.bf16.msra.mxu0 %v1383_v57  ;;  %v931_v0 = vld [vmem:[%s1788_s6 + $0x8] sm:$0xff] }
 0x322   : > { %1238 = vmatmul.mubr.msk.bf16.vlgmr.msra.gmra.mxu0 %vm885_vm6, %v1384_v59 }
 0x3e2   : > { %v923_v61 = vpop.f32.mrf.mxu0 }
 0x3e3   : > { %v932_v62 = vadd.f32 %v930_v60, %v923_v61 }
 0x3e4   : > { %v1239_v63 = vpop.f32.mrf.mxu0 }
 0x3e5   : > { %934 = vst [vmem:[%s1788_s6] sm:$0xff] %v932_v62 }
 0x3e6   : > { %v926_v1 = vpop.f32.mrf.mxu0 }
 0x3e7   : > { %v933_v2 = vadd.f32 %v931_v0, %v926_v1 }
 0x3e8   : > { %v1240_v3 = vpop.f32.mrf.mxu0 }
 0x3e9   : > { %935 = vst [vmem:[%s1788_s6 + $0x8] sm:$0xff] %v933_v2 }
 0x3ea PF: > { %s1158_s7 = sshll.u32 %s1535_s10, 7  ;;  %s1964_s15 = sld [smem:[#allocation25_spill]] }
 0x3eb   : > { %s952_s16 = sshll.u32 %s1788_s6, 4  ;;  %s937_s21 = scalar_lea.sflag [#allocation7], %s1777_s8  ;;  %s1844_s16 = int_to_ptr.vmem [resolvable:$true] %s952_s16 }
 0x3ec   : > { %s1411_s22 = scalar_lea.vmem %s1844_s16, 256  ;;  %s1560_s0 = smov [#allocation9]  }
 0x3ed   : > { %p1412_p11 = scmp.ne.s32.totalorder %s1844_s16, %s1411_s22  ;;  %s1415_s30 = sshll.u32 %s1560_s0, 4  ;;  %s1416_s30 = int_to_ptr.vmem [resolvable:$false] %s1415_s30 }
 0x3ee   : > { %s1417_s10 = scalar_lea.vmem %s1416_s30, 512  ;;  %p1418_p4 = scmp.lt.s32.totalorder %s1844_s16, %s1416_s30 }
 0x3ef   : > { %p1413_p13 = pnand %p1412_p11, %p1733_p6  ;;  %p1419_p7 = scmp.lt.s32.totalorder %s1417_s10, %s1411_s22 }
 0x3f0   : > { %s1841_s17 = scalar_lea.hbm %s1964_s15, %s1158_s7 }
 0x3f1   : > { %p1414_p1 = pneg %p1413_p13  ;;  %p1420_p0 = por %p1419_p7, %p1418_p4 }
 0x3f3   : > { %p1421_p5 = pnand %p1420_p0, %p1414_p1 }
 0x3f5   : > { %1424 = shalt.err (!%p1421_p5)
}
 0x3f6   : > { %s1425_s6 = scalar_lea.hbm %s1841_s17, 256  ;;  %s1429_s18 = scalar_lea.hbm %s1964_s15, 512 }
 0x3f7   : > { %p1426_p9 = scmp.ne.s32.totalorder %s1841_s17, %s1425_s6  ;;  %p1430_p3 = scmp.lt.s32.totalorder %s1841_s17, %s1964_s15 }
 0x3f8   : > { %p1431_p10 = scmp.lt.s32.totalorder %s1429_s18, %s1425_s6 }
 0x3f9   : > { %p1427_p12 = pnand %p1426_p9, %p1733_p6 }
 0x3fa   : > { %p1432_p11 = por %p1431_p10, %p1430_p3 }
 0x3fb   : > { %p1428_p2 = pneg %p1427_p12 }
 0x3fd   : > { %p1433_p13 = pnand %p1432_p11, %p1428_p2 }
 0x3ff   : > { %1436 = shalt.err (!%p1433_p13)
}
 0x400   : > { %s1561_s7 = smov 128   ;;  %s1562_s1 = smov 256  }
 0x401   : > { %s1563_s23 = smov 8  }
 0x402   : > { %1243 = dma.vmem_to_hbm [thread:$0]  (%p1733_p6), %s1844_s16, 256, %s1841_s17, %s937_s21, %s1561_s7, %s1562_s1, %s1563_s23  }
 0x403 PF: > { %s1965_s22 = sld [smem:[#allocation12_spill]]  ;;  %p1249_p1 = scmp.ge.s32.totalorder %s1547_s13, 2 }
 0x405   : > { %p1246_p4 = pnand %p1249_p1, %p1737_p8 }
 0x407   : > { %p1247_p7 = pneg %p1246_p4 }
 0x409   : > { %s967_s30 = sand.u32 1, %s1965_s22  }
 0x40a   : > { %s968_s10 = scalar_lea.sflag [#allocation7], %s967_s30 }
 0x40b   : > { %1494 = dma.done.wait (%p1247_p7), %s968_s10, 256  }
 0x40c   : > { %1496 = vsyncadd (%p1247_p7), %s968_s10, 4294967040  ;;  %s23_s13 = sadd.s32 1, %s1547_s13   ;;  %s1968_s8 = sld [smem:[#allocation18_spill]] }
 0x40d   : > { %p1874_p0 = scmp.ge.s32.totalorder %s23_s13, 6   ;;  %s1969_s9 = sld [smem:[#allocation17_spill]] }
 0x40e   : > { %s1970_s30 = sld [smem:[#allocation13_spill]]  ;;  %s1974_s24 = smov %s1503_s25 }
 0x40f   : > { %s1971_s17 = sld [smem:[#allocation16_spill]]  ;;  %s1975_s25 = smov %s1507_s26 }
 0x410   : > { %s1972_s16 = sld [smem:[#allocation14_spill]]  ;;  %s1977_s27 = smov %s1515_s28 }
 0x411   : > { %s1973_s21 = sld [smem:[#allocation15_spill]]  ;;  %s1978_s28 = smov %s1519_s29 }
 0x412   : > { %s1976_s26 = smov %s1968_s8  ;;  %s1982_s10 = smov %s1543_s12 }
 0x413   : > { %s1979_s29 = smov %s1969_s9  ;;  %s1981_s9 = smov %s1539_s11 }
 0x414   :  { %22 = sbr.rel (!%p1874_p0) target bundleno = 16 (0x10), region = 218 }
 0x415   : > { %s1980_s8 = smov %s1971_s17 }
 0x416   : > { %s1983_s11 = smov %s1972_s16 }
 0x417   : > { %s1984_s12 = smov %s1973_s21 }
 0x419   :  { %973 = vsyncpa [#allocation6], 1 }
 0x41a   :  { %975 = vsyncpa [#allocation6 + $0x1], 1 }
 0x41b   :  { %976 = vsyncpa [#allocation7], 1 }
 0x41c   :  { %978 = vsyncpa [#allocation7 + $0x1], 1 }

</bundles_post_ra>
